<compile_context>
chip_gen: v5e
topology: v5e:2x2
jax: 0.10.0
libtpu: 0.0.40
codegen_flags: <defaults>
</compile_context>

<pallas_src>
import jax
import jax.numpy as jnp
import numpy as np
from jax.experimental import pallas as pl
from jax.experimental.pallas import tpu as pltpu


def _round_up(n, m):
    return ((n + m - 1) // m) * m


def _mlp_kernel(t_ref, x_ref, w1_ref, b1_ref, w2_ref, b2_ref, o_ref):
    # t_ref: SMEM scalar-prefetch ref; it is consumed by the weight index_maps
    # (data-dependent slab selection), unused in the body.
    del t_ref
    x = x_ref[...]                                       # (TB, F_in_p)  compute dtype
    h = jnp.dot(x, w1_ref[...],
                preferred_element_type=jnp.float32) + b1_ref[...]   # f32 accumulate
    h = jnp.maximum(h, 0.0)
    o = jnp.dot(h.astype(w2_ref.dtype), w2_ref[...],
                preferred_element_type=jnp.float32) + b2_ref[...]
    o_ref[...] = o.astype(o_ref.dtype)


def model_full_forward(tup, params, is_discretized=False, *,
                       compute_dtype=jnp.bfloat16, block_b=512):
    """Pallas equivalent of ModelFull.forward((t, x))."""
    t, x = tup
    w1, b1, w2, b2 = params["w1"], params["b1"], params["w2"], params["b2"]
    B, F_in = x.shape
    T, _, H = w1.shape
    F_out = w2.shape[-1]

    # ---- lane-dense / sublane-dense padding ------------------------------------
    F_in_p = _round_up(F_in, 128)
    H_p = _round_up(H, 128)
    F_out_p = _round_up(F_out, 128)

    tb = _round_up(min(block_b, _round_up(B, 8)), 8)     # batch tile (multiple of 8)
    B_p = _round_up(B, tb)
    n_b = B_p // tb

    assert tb % 8 == 0 and F_in_p % 128 == 0 and H_p % 128 == 0 and F_out_p % 128 == 0

    cd = compute_dtype
    xp = jnp.zeros((B_p, F_in_p), cd).at[:B, :F_in].set(x.astype(cd))
    w1p = jnp.zeros((T, F_in_p, H_p), cd).at[:, :F_in, :H].set(w1.astype(cd))
    b1p = jnp.zeros((T, 1, H_p), jnp.float32).at[:, :, :H].set(b1.astype(jnp.float32))
    w2p = jnp.zeros((T, H_p, F_out_p), cd).at[:, :H, :F_out].set(w2.astype(cd))
    b2p = jnp.zeros((T, 1, F_out_p), jnp.float32).at[:, :, :F_out].set(b2.astype(jnp.float32))

    # non-discretized: the single model lives in slab 0 and t is ignored,
    # matching `self.model(x)`.
    t_idx = jnp.asarray([t if is_discretized else 0], dtype=jnp.int32)

    grid_spec = pltpu.PrefetchScalarGridSpec(
        num_scalar_prefetch=1,
        grid=(n_b,),
        in_specs=[
            # x moves with the batch-grid axis.
            pl.BlockSpec((tb, F_in_p), lambda i, t_ref: (i, 0)),
            # Weights: constant block index across the grid -> DMA'd once,
            # stay VMEM-resident for all batch tiles; slab chosen by t_ref.
            pl.BlockSpec((pl.Squeezed(), F_in_p, H_p), lambda i, t_ref: (t_ref[0], 0, 0)),
            pl.BlockSpec((pl.Squeezed(), 1, H_p), lambda i, t_ref: (t_ref[0], 0, 0)),
            pl.BlockSpec((pl.Squeezed(), H_p, F_out_p), lambda i, t_ref: (t_ref[0], 0, 0)),
            pl.BlockSpec((pl.Squeezed(), 1, F_out_p), lambda i, t_ref: (t_ref[0], 0, 0)),
        ],
        out_specs=pl.BlockSpec((tb, F_out_p), lambda i, t_ref: (i, 0)),
    )

    out_p = pl.pallas_call(
        _mlp_kernel,
        out_shape=jax.ShapeDtypeStruct((B_p, F_out_p), x.dtype),
        grid_spec=grid_spec,
        compiler_params=pltpu.CompilerParams(
            dimension_semantics=("parallel",),   # batch tiles are independent (v7x 2-TC)
        ),
    )(t_idx, xp, w1p, b1p, w2p, b2p)

    return out_p[:B, :F_out]


def init_params(key, T, F_in, H, F_out):
    """Deterministic init of T stacked MLPs (synthetic weights, no checkpoint)."""
    k1, k2, k3, k4 = jax.random.split(key, 4)
    return {
        "w1": jax.random.normal(k1, (T, F_in, H), jnp.float32) * 0.1,
        "b1": jax.random.normal(k2, (T, 1, H), jnp.float32) * 0.1,
        "w2": jax.random.normal(k3, (T, H, F_out), jnp.float32) * 0.1,
        "b2": jax.random.normal(k4, (T, 1, F_out), jnp.float32) * 0.1,
    }


def _reference(t, x, params, is_discretized, compute_dtype=jnp.bfloat16):
    """Pure-JAX reference following the same compute-dtype path as the kernel."""
    idx = t if is_discretized else 0
    cd = compute_dtype
    h = jnp.dot(x.astype(cd), params["w1"][idx].astype(cd),
                preferred_element_type=jnp.float32) + params["b1"][idx]
    h = jnp.maximum(h, 0.0)
    o = jnp.dot(h.astype(cd), params["w2"][idx].astype(cd),
                preferred_element_type=jnp.float32) + params["b2"][idx]
    return o.astype(x.dtype)


if __name__ == "__main__":
    # NOTE: at these demo sizes the work (~KFLOPs) is dwarfed by launch overhead;
    # the kernel is structured so larger B / F_in / H / F_out tile cleanly.
    B, F_in, H, F_out, T = 8, 16, 32, 8, 3
    key = jax.random.PRNGKey(0)
    kx, kp, kx2 = jax.random.split(key, 3)

    x = jax.random.normal(kx, (B, F_in), jnp.float32)
    params = init_params(kp, T, F_in, H, F_out)

    # is_discretized=True path: model[t](x)
    t = 1
    out_disc = jax.block_until_ready(model_full_forward((t, x), params, is_discretized=True))
    # is_discretized=False path: model(x)  (single model lives in slab 0)
    out_plain = jax.block_until_ready(model_full_forward((t, x), params, is_discretized=False))

    ref_disc = _reference(t, x, params, True)
    ref_plain = _reference(t, x, params, False)
    assert np.allclose(np.asarray(out_disc), np.asarray(ref_disc), atol=1e-2, rtol=1e-2)
    assert np.allclose(np.asarray(out_plain), np.asarray(ref_plain), atol=1e-2, rtol=1e-2)

    # Exercise the batch-tiled grid path (multiple grid steps, ragged batch).
    x_big = jax.random.normal(kx2, (200, F_in), jnp.float32)
    out_big = jax.block_until_ready(
        model_full_forward((2, x_big), params, is_discretized=True, block_b=64))
    ref_big = _reference(2, x_big, params, True)
    assert out_big.shape == (200, F_out)
    assert np.allclose(np.asarray(out_big), np.asarray(ref_big), atol=1e-2, rtol=1e-2)

    print("KERNEL_OK")
</pallas_src>

<mosaic_0001>
module attributes {stable_mosaic.version = 11 : i64} {
  func.func @_mlp_kernel(%arg0: i32, %arg1: memref<1xi32, #tpu.memory_space<smem>>, %arg2: memref<8x128xbf16, #tpu.memory_space<vmem>>, %arg3: memref<1x128x128xbf16, #tpu.memory_space<vmem>>, %arg4: memref<1x1x128xf32, #tpu.memory_space<vmem>>, %arg5: memref<1x128x128xbf16, #tpu.memory_space<vmem>>, %arg6: memref<1x1x128xf32, #tpu.memory_space<vmem>>, %arg7: memref<8x128xf32, #tpu.memory_space<vmem>>) attributes {dimension_semantics = [#tpu.dimension_semantics<parallel>], iteration_bounds = array<i64: 1>, scalar_prefetch = 1 : i64, scratch_operands = 0 : i64, tpu.core_type = #tpu.core_type<tc>, window_params = [{transform_indices = @transform_0, window_bounds = array<i64: 8, 128>}, {transform_indices = @transform_1, window_bounds = array<i64: 1, 128, 128>}, {transform_indices = @transform_2, window_bounds = array<i64: 1, 1, 128>}, {transform_indices = @transform_3, window_bounds = array<i64: 1, 128, 128>}, {transform_indices = @transform_4, window_bounds = array<i64: 1, 1, 128>}, {transform_indices = @transform_5, window_bounds = array<i64: 8, 128>}]} {
    %c0 = arith.constant 0 : index
    %c0_0 = arith.constant 0 : index
    %0 = vector.load %arg2[%c0, %c0_0] : memref<8x128xbf16, #tpu.memory_space<vmem>>, vector<8x128xbf16>
    %c0_1 = arith.constant 0 : index
    %c0_2 = arith.constant 0 : index
    %c0_3 = arith.constant 0 : index
    %1 = vector.load %arg3[%c0_1, %c0_2, %c0_3] : memref<1x128x128xbf16, #tpu.memory_space<vmem>>, vector<1x128x128xbf16>
    %2 = vector.shape_cast %1 : vector<1x128x128xbf16> to vector<128x128xbf16>
    %cst = arith.constant dense<0.000000e+00> : vector<8x128xf32>
    %3 = tpu.matmul %0, %2, %cst {dimension_numbers = #tpu.dot_dimension_numbers<[1], [0], [0], [1], [0, 0, 1, 1], [], []>} : vector<8x128xbf16>, vector<128x128xbf16>, vector<8x128xf32> -> vector<8x128xf32>
    %c0_4 = arith.constant 0 : index
    %c0_5 = arith.constant 0 : index
    %c0_6 = arith.constant 0 : index
    %4 = vector.load %arg4[%c0_4, %c0_5, %c0_6] : memref<1x1x128xf32, #tpu.memory_space<vmem>>, vector<1x1x128xf32>
    %5 = vector.shape_cast %4 : vector<1x1x128xf32> to vector<1x128xf32>
    %6 = vector.broadcast %5 : vector<1x128xf32> to vector<8x128xf32>
    %7 = arith.addf %3, %6 : vector<8x128xf32>
    %cst_7 = arith.constant 0.000000e+00 : f32
    %8 = vector.broadcast %cst_7 : f32 to vector<8x128xf32>
    %9 = arith.maximumf %7, %8 : vector<8x128xf32>
    %10 = arith.truncf %9 : vector<8x128xf32> to vector<8x128xbf16>
    %c0_8 = arith.constant 0 : index
    %c0_9 = arith.constant 0 : index
    %c0_10 = arith.constant 0 : index
    %11 = vector.load %arg5[%c0_8, %c0_9, %c0_10] : memref<1x128x128xbf16, #tpu.memory_space<vmem>>, vector<1x128x128xbf16>
    %12 = vector.shape_cast %11 : vector<1x128x128xbf16> to vector<128x128xbf16>
    %cst_11 = arith.constant dense<0.000000e+00> : vector<8x128xf32>
    %13 = tpu.matmul %10, %12, %cst_11 {dimension_numbers = #tpu.dot_dimension_numbers<[1], [0], [0], [1], [0, 0, 1, 1], [], []>} : vector<8x128xbf16>, vector<128x128xbf16>, vector<8x128xf32> -> vector<8x128xf32>
    %c0_12 = arith.constant 0 : index
    %c0_13 = arith.constant 0 : index
    %c0_14 = arith.constant 0 : index
    %14 = vector.load %arg6[%c0_12, %c0_13, %c0_14] : memref<1x1x128xf32, #tpu.memory_space<vmem>>, vector<1x1x128xf32>
    %15 = vector.shape_cast %14 : vector<1x1x128xf32> to vector<1x128xf32>
    %16 = vector.broadcast %15 : vector<1x128xf32> to vector<8x128xf32>
    %17 = arith.addf %13, %16 : vector<8x128xf32>
    %c0_15 = arith.constant 0 : index
    %c0_16 = arith.constant 0 : index
    %18 = vector.load %arg7[%c0_15, %c0_16] : memref<8x128xf32, #tpu.memory_space<vmem>>, vector<8x128xf32>
    tpu.vector_store %arg7[%c0_15, %c0_16], %17 {strides = array<i32>} : memref<8x128xf32, #tpu.memory_space<vmem>>, vector<8x128xf32>,
    return
  }
  func.func @transform_0(%arg0: i32, %arg1: memref<1xi32, #tpu.memory_space<smem>>) -> (i32, i32) {
    %c0_i32 = arith.constant 0 : i32
    %c0_i32_0 = arith.constant 0 : i32
    return %arg0, %c0_i32 : i32, i32
  }
  func.func @transform_1(%arg0: i32, %arg1: memref<1xi32, #tpu.memory_space<smem>>) -> (i32, i32, i32) {
    %c0 = arith.constant 0 : index
    %0 = memref.load %arg1[%c0] : memref<1xi32, #tpu.memory_space<smem>>
    %c0_i32 = arith.constant 0 : i32
    %c0_i32_0 = arith.constant 0 : i32
    %c0_i32_1 = arith.constant 0 : i32
    return %0, %c0_i32, %c0_i32_0 : i32, i32, i32
  }
  func.func @transform_2(%arg0: i32, %arg1: memref<1xi32, #tpu.memory_space<smem>>) -> (i32, i32, i32) {
    %c0 = arith.constant 0 : index
    %0 = memref.load %arg1[%c0] : memref<1xi32, #tpu.memory_space<smem>>
    %c0_i32 = arith.constant 0 : i32
    %c0_i32_0 = arith.constant 0 : i32
    %c0_i32_1 = arith.constant 0 : i32
    return %0, %c0_i32, %c0_i32_0 : i32, i32, i32
  }
  func.func @transform_3(%arg0: i32, %arg1: memref<1xi32, #tpu.memory_space<smem>>) -> (i32, i32, i32) {
    %c0 = arith.constant 0 : index
    %0 = memref.load %arg1[%c0] : memref<1xi32, #tpu.memory_space<smem>>
    %c0_i32 = arith.constant 0 : i32
    %c0_i32_0 = arith.constant 0 : i32
    %c0_i32_1 = arith.constant 0 : i32
    return %0, %c0_i32, %c0_i32_0 : i32, i32, i32
  }
  func.func @transform_4(%arg0: i32, %arg1: memref<1xi32, #tpu.memory_space<smem>>) -> (i32, i32, i32) {
    %c0 = arith.constant 0 : index
    %0 = memref.load %arg1[%c0] : memref<1xi32, #tpu.memory_space<smem>>
    %c0_i32 = arith.constant 0 : i32
    %c0_i32_0 = arith.constant 0 : i32
    %c0_i32_1 = arith.constant 0 : i32
    return %0, %c0_i32, %c0_i32_0 : i32, i32, i32
  }
  func.func @transform_5(%arg0: i32, %arg1: memref<1xi32, #tpu.memory_space<smem>>) -> (i32, i32) {
    %c0_i32 = arith.constant 0 : i32
    %c0_i32_0 = arith.constant 0 : i32
    return %arg0, %c0_i32 : i32, i32
  }
}

</mosaic_0001>

<bundles_post_ra>
// kernel: tpu_custom_call.1
= control target key start
LH: loop header
LB: loop body
LE: loop exit
PB: predicated region body
PF: predicated region fallthrough
CT: control target
= control target key end

     0   :  { %12 = vsyncpa [#allocation5], 0  ;;  %s623_s0 = inlined_call_operand.<no memory space> [shape: s32[1], index: 0, kind: input, shape index: {}]   ;;  %s624_s1 = inlined_call_operand.hbm [shape: bf16[8,128], index: 1, kind: input, shape index: {}]   ;;  %s625_s2 = inlined_call_operand.hbm [shape: bf16[3,128,128], index: 2, kind: input, shape index: {}]   ;;  %s626_s3 = inlined_call_operand.vmem [shape: f32[3,1,128], index: 3, kind: input, shape index: {}]   ;;  %s627_s4 = inlined_call_operand.hbm [shape: bf16[3,128,128], index: 4, kind: input, shape index: {}]   ;;  %s628_s5 = inlined_call_operand.hbm [shape: f32[3,1,128], index: 5, kind: input, shape index: {}]   ;;  %s629_s6 = inlined_call_operand.hbm [shape: f32[8,128], index: 6, kind: output, shape index: {}]  }
   0x1   :  { %13 = vsyncpa [#allocation8], 0 }
   0x2   :  { %14 = vsyncpa [#allocation11], 0  ;;  %s370_s23 = sshll.u32 %s623_s0, 6 }
   0x3   :  { %15 = vsyncpa [#allocation6], 0  ;;  %s34_s26 = scalar_lea.hbm %s625_s2, %s370_s23  ;;  %s525_s27 = smov [#allocation7]  }
   0x4   :  { %s37_s28 = sshll.u32 %s525_s27, 4  ;;  %s35_s29 = sshll.u32 %s34_s26, 4  ;;  %s38_s28 = int_to_ptr.vmem [resolvable:$true] %s37_s28  ;;  %s36_s29 = int_to_ptr.hbm [resolvable:$true] %s35_s29 }
   0x5   :  { %s58_s8 = scalar_lea.hbm %s627_s4, %s370_s23  ;;  %s397_s9 = sshra.s32 %s36_s29, 4  ;;  %s398_s9 = int_to_ptr.hbm [resolvable:$true] %s397_s9 }
   0x6   :  { %s399_s10 = scalar_lea.hbm %s398_s9, 64  ;;  %s401_s13 = scalar_lea.hbm %s625_s2, 192 }
   0x7   :  { %p400_p0 = scmp.ne.s32.totalorder %s398_s9, %s399_s10  ;;  %p402_p1 = scmp.lt.s32.totalorder %s398_s9, %s625_s2 }
   0x8   :  { %p403_p2 = scmp.lt.s32.totalorder %s401_s13, %s399_s10 }
   0xa   :  { %p404_p3 = por %p403_p2, %p402_p1 }
   0xc   :  { %p405_p4 = pnand %p404_p3, %p400_p0 }
   0xe   :  { %408 = shalt.err (!%p405_p4)
}
   0xf   :  { %s526_s16 = smov 64   ;;  %s527_s17 = smov 4  }
  0x10   :  { %43 = dma.hbm_to_vmem [thread:$0]  %s36_s29, 1024, %s38_s28, [#allocation8], %s526_s16, %s526_s16, %s527_s17  }
  0x11   :  { %s21_s20 = sshll.u32 %s624_s1, 4  ;;  %s528_s21 = smov [#allocation4]   ;;  %s22_s20 = int_to_ptr.hbm [resolvable:$true] %s21_s20 }
  0x12   :  { %s23_s22 = sshll.u32 %s528_s21, 4  ;;  %s59_s23 = sshll.u32 %s58_s8, 4  ;;  %s24_s22 = int_to_ptr.vmem [resolvable:$true] %s23_s22  ;;  %s60_s23 = int_to_ptr.hbm [resolvable:$true] %s59_s23 }
  0x13   :  { %26 = dma.hbm_to_vmem [thread:$0]  %s22_s20, 64, %s24_s22, [#allocation5]  }
  0x14   :  { %s529_s24 = smov [#allocation9]   ;;  %s73_s28 = scalar_lea.hbm %s628_s5, %s623_s0 }
  0x15   :  { %s61_s2 = sshll.u32 %s529_s24, 4  ;;  %s75_s29 = sshll.u32 %s73_s28, 4  ;;  %s62_s2 = int_to_ptr.vmem [resolvable:$true] %s61_s2  ;;  %s76_s29 = int_to_ptr.hbm [resolvable:$true] %s75_s29 }
  0x16   :  { %s445_s7 = sshra.s32 %s60_s23, 4  ;;  %s449_s8 = scalar_lea.hbm %s627_s4, 192  ;;  %s446_s7 = int_to_ptr.hbm [resolvable:$true] %s445_s7 }
  0x17   :  { %s447_s1 = scalar_lea.hbm %s446_s7, 64  ;;  %p450_p6 = scmp.lt.s32.totalorder %s446_s7, %s627_s4 }
  0x18   :  { %p448_p5 = scmp.ne.s32.totalorder %s446_s7, %s447_s1  ;;  %p451_p7 = scmp.lt.s32.totalorder %s449_s8, %s447_s1 }
  0x1a   :  { %p452_p8 = por %p451_p7, %p450_p6 }
  0x1c   :  { %p453_p9 = pnand %p452_p8, %p448_p5 }
  0x1e   :  { %456 = shalt.err (!%p453_p9)
}
  0x1f   :  { %67 = dma.hbm_to_vmem [thread:$0]  %s60_s23, 1024, %s62_s2, [#allocation8], %s526_s16, %s526_s16, %s527_s17  }
  0x20   :  { %s530_s13 = smov [#allocation10]   ;;  %s469_s15 = sshra.s32 %s76_s29, 4  ;;  %s470_s15 = int_to_ptr.hbm [resolvable:$true] %s469_s15 }
  0x21   :  { %s77_s14 = sshll.u32 %s530_s13, 4  ;;  %s471_s18 = scalar_lea.hbm %s470_s15, 1  ;;  %s78_s14 = int_to_ptr.vmem [resolvable:$true] %s77_s14 }
  0x22   :  { %p472_p10 = scmp.ne.s32.totalorder %s470_s15, %s471_s18  ;;  %s473_s21 = scalar_lea.hbm %s628_s5, 3 }
  0x23   :  { %p474_p11 = scmp.lt.s32.totalorder %s470_s15, %s628_s5  ;;  %p475_p12 = scmp.lt.s32.totalorder %s473_s21, %s471_s18 }
  0x25   :  { %p476_p13 = por %p475_p12, %p474_p11 }
  0x27   :  { %p477_p0 = pnand %p476_p13, %p472_p10 }
  0x29   :  { %480 = shalt.err (!%p477_p0)
}
  0x2a   :  { %80 = dma.hbm_to_vmem [thread:$0]  %s76_s29, 16, %s78_s14, [#allocation11]  }
  0x2b   :  { %517 = dma.done.wait [#allocation5], 64  }
  0x2c   :  { %518 = vsyncadd [#allocation5], 4294967232 }
  0x2d   :  { %519 = dma.done.wait [#allocation8], 2048  }
  0x2e   :  { %520 = vsyncadd [#allocation8], 4294965248 }
  0x2f   :  { %521 = dma.done.wait [#allocation11], 16  }
  0x30   :  { %522 = vsyncadd [#allocation11], 4294967280  ;;  %p103_p1 = scmp.lt.s32.totalorder %s623_s0, 2  ;;  %v379_v0 = vld [vmem:[#allocation7 + $0x38] sm:$0xff]  ;;  %v378_v1 = vld [vmem:[#allocation7 + $0x30] sm:$0xff]  ;;  %s531_s30 = smov [#allocation12]  }
  0x31   :  { %178 = vmatpush.bf16.msra.mxu0 %v379_v0  ;;  %v387_v2 = vld [vmem:[#allocation9 + $0x38] sm:$0xff]  ;;  %v386_v3 = vld [vmem:[#allocation9 + $0x30] sm:$0xff]  ;;  %v377_v4 = vld [vmem:[#allocation7 + $0x28] sm:$0xff]  ;;  %s280_s28 = sshll.u32 %s531_s30, 4  ;;  %s282_s1 = sshll.u32 %s629_s6, 4  ;;  %s281_s28 = int_to_ptr.vmem [resolvable:$true] %s280_s28  ;;  %s283_s1 = int_to_ptr.hbm [resolvable:$true] %s282_s1 }
  0x32   :  { %s631_s0 = smov (!%p103_p1, %s623_s0), 2  ;;  %261 = vmatpush.bf16.msra.mxu1 %v387_v2  ;;  %v385_v5 = vld [vmem:[#allocation9 + $0x28] sm:$0xff]  ;;  %v376_v6 = vld [vmem:[#allocation7 + $0x20] sm:$0xff]  ;;  %v375_v8 = vld [vmem:[#allocation7 + $0x18] sm:$0xff] }
  0x33   :  { %s105_s25 = scalar_lea.vmem %s626_s3, %s631_s0  ;;  %v384_v7 = vld [vmem:[#allocation9 + $0x20] sm:$0xff]  ;;  %v383_v9 = vld [vmem:[#allocation9 + $0x18] sm:$0xff]  ;;  %v374_v10 = vld [vmem:[#allocation7 + $0x10] sm:$0xff] }
  0x34   :  { %v382_v11 = vld [vmem:[#allocation9 + $0x10] sm:$0xff]  ;;  %v373_v12 = vld [vmem:[#allocation7 + $0x8] sm:$0xff]  ;;  %v372_v13 = vld [vmem:[#allocation7] sm:$0xff] }
  0x35   :  { %179 = vmatpush.bf16.msra.mxu0 %v378_v1  ;;  %v109_v14 = vld [vmem:[#allocation4] sm:$0xf]  ;;  %v381_v15 = vld [vmem:[#allocation9 + $0x8] sm:$0xff]  ;;  %v380_v16 = vld [vmem:[#allocation9] sm:$0xff] }
  0x36   :  { %262 = vmatpush.bf16.msra.mxu1 %v386_v3  ;;  %v395_v17 = vld [vmem:[%s105_s25] ss:$0 sm:$0xff]  ;;  %v396_v23 = vld [vmem:[#allocation10] ss:$0 sm:$0xff] }
  0x39   :  { %180 = vmatpush.bf16.msra.mxu0 %v377_v4 }
  0x3a   :  { %263 = vmatpush.bf16.msra.mxu1 %v385_v5 }
  0x3d   :  { %181 = vmatpush.bf16.msra.mxu0 %v376_v6 }
  0x3e   :  { %264 = vmatpush.bf16.msra.mxu1 %v384_v7 }
  0x41   :  { %182 = vmatpush.bf16.msra.mxu0 %v375_v8 }
  0x42   :  { %265 = vmatpush.bf16.msra.mxu1 %v383_v9 }
  0x45   :  { %183 = vmatpush.bf16.msra.mxu0 %v374_v10 }
  0x46   :  { %266 = vmatpush.bf16.msra.mxu1 %v382_v11 }
  0x49   :  { %184 = vmatpush.bf16.msra.mxu0 %v373_v12 }
  0x4a   :  { %267 = vmatpush.bf16.msra.mxu1 %v381_v15 }
  0x4d   :  { %185 = vmatpush.bf16.msra.mxu0 %v372_v13 }
  0x4e   :  { %268 = vmatpush.bf16.msra.mxu1 %v380_v16 }
  0x50   :  { %186 = vmatmul.bf16.vlgmr.msra.gmra.mxu0 %v109_v14 }
  0xcd   :  { %v187_v18 = vpop.f32.mrf.mxu0 }
  0xce   :  { %v188_v19 = vadd.f32 %v395_v17, %v187_v18 }
  0xd0   :  { %v191_v20 = vmax.f32 %v188_v19, 0.0 }
  0xd2   :  { %v192_v21 = vpack.c.bf16 %v191_v20, %v191_v20 }
  0xd4   :  { %269 = vmatmul.bf16.vlgmr.msra.gmra.mxu1 %v192_v21 }
  0xd5   :  { %v189_v22 = vpop.f32.mrf.mxu0 }
 0x151   :  { %v270_v24 = vpop.f32.mrf.mxu1 }
 0x152   :  { %v271_v25 = vadd.f32 %v396_v23, %v270_v24 }
 0x154   :  { %274 = vst [vmem:[#allocation12] sm:$0xff] %v271_v25 }
 0x155   :  { %285 = dma.vmem_to_hbm [thread:$0]  %s281_s28, 128, %s283_s1, [#allocation6]  }
 0x159   :  { %v272_v26 = vpop.f32.mrf.mxu1 }
 0x15a   :  { %523 = dma.done.wait [#allocation6], 128  }
 0x15b   :  { %524 = vsyncadd [#allocation6], 4294967168 }
 0x15c   :  { %290 = vsyncpa [#allocation5], 1 }
 0x15d   :  { %291 = vsyncpa [#allocation8], 1 }
 0x15e   :  { %292 = vsyncpa [#allocation11], 1 }
 0x15f   :  { %293 = vsyncpa [#allocation6], 1 }

</bundles_post_ra>
